<compile_context>
chip_gen: v7x
topology: tpu7x:2x2x1
jax: 0.10.0
libtpu: 0.0.40
codegen_flags: <defaults>
</compile_context>

<pallas_src>
import functools

import jax
import jax.numpy as jnp
from jax.experimental import pallas as pl
from jax.experimental.pallas import tpu as pltpu

_LANE = 128     # lane width: hidden/output feature dims padded to this
_SUBLANE = 8    # sublane width: batch tile is a multiple of this


def _round_up(x, m):
    return ((x + m - 1) // m) * m


def _fused_mlp_kernel(x_ref, *refs, n_layers, mid, half_range):
    """Whole Actor MLP in one kernel body.

    refs = (w0, b0, w1, b1, ..., w_{L-1}, b_{L-1}, o_ref)
    Hidden layers: relu(x @ W + b); last layer: mid + half_range * tanh(x @ W + b).
    Activations stay in vregs; weights stay VMEM-resident across batch tiles.
    """
    o_ref = refs[-1]
    wb = refs[:-1]
    x = x_ref[...]
    for l in range(n_layers):
        w = wb[2 * l][...]
        if w.dtype != jnp.float32:
            # bf16-resident weights: upcast in-regs, accumulate in f32 on the MXU.
            w = w.astype(jnp.float32)
        b = wb[2 * l + 1][...]
        y = jnp.dot(x, w, preferred_element_type=jnp.float32) + b
        if l < n_layers - 1:
            x = jnp.maximum(y, 0.0)
        else:
            # tanh lowers to the EUP (idle slot in this kernel) -> effectively free.
            o_ref[...] = mid + half_range * jnp.tanh(y)


class Actor:
    """JAX/Pallas port of the PyTorch Actor MLP (fused single-kernel forward).

    H linear layers: (n->dim), (dim->dim) x (H-2), (dim->m).
    First H-1 layers use ReLU; last layer is tanh scaled to [action_min, action_max].
    """

    def __init__(self, n, m, dim, H, action_max, action_min, key,
                 max_batch_tile=256, weight_dtype=jnp.float32):
        assert H >= 2, "Actor needs at least 2 linear layers"
        self.n = n
        self.m = m
        self.dim = dim
        self.H = H
        self.action_max = float(action_max)
        self.action_min = float(action_min)
        self._mid = (self.action_max + self.action_min) / 2.0
        self._half_range = (self.action_max - self.action_min) / 2.0
        # Clamp to a multiple of 8 sublanes so blocks are always (8,128)-aligned.
        self._max_batch_tile = max(_SUBLANE, _round_up(int(max_batch_tile), _SUBLANE))
        self._weight_dtype = weight_dtype
        self._dim_pad = _round_up(dim, _LANE)
        self._m_pad = _round_up(m, _LANE)
        self._single_buffered_ok = None  # resolved on first forward

        sizes = [(n, dim)] + [(dim, dim)] * (H - 2) + [(dim, m)]
        self.params = []          # PyTorch-layout (out, in) / (out,) -- for reference()
        self._padded_params = []  # kernel-layout (in[, pad], out_pad) / (1, out_pad)
        for idx, (fan_in, fan_out) in enumerate(sizes):
            key, kw, kb = jax.random.split(key, 3)
            # PyTorch nn.Linear default init: U(-1/sqrt(fan_in), 1/sqrt(fan_in))
            bound = 1.0 / (fan_in ** 0.5)
            w = jax.random.uniform(kw, (fan_out, fan_in), jnp.float32, -bound, bound)
            b = jax.random.uniform(kb, (fan_out,), jnp.float32, -bound, bound)
            self.params.append((w, b))

            # First layer keeps its true input dim (K<128 is fine on the MXU, and it
            # removes the host-side input pad); hidden/output dims are lane-padded so
            # intermediates and the output store stay 128-lane dense. Zero-padded rows/
            # cols + zero biases keep padded lanes exactly 0 through the ReLU stack.
            in_pad = fan_in if idx == 0 else _round_up(fan_in, _LANE)
            out_pad = _round_up(fan_out, _LANE)
            w_t = jnp.zeros((in_pad, out_pad), jnp.float32).at[:fan_in, :fan_out].set(w.T)
            w_t = w_t.astype(self._weight_dtype)          # optional bf16 residency
            b_p = jnp.zeros((1, out_pad), jnp.float32).at[0, :fan_out].set(b)
            self._padded_params.append((w_t, b_p))

    # ---------------------------------------------------------------- forward
    def _pallas_forward(self, x, B_pad, tile_b, single_buffer_weights):
        kernel = functools.partial(
            _fused_mlp_kernel, n_layers=self.H,
            mid=self._mid, half_range=self._half_range)

        const_map = lambda i: (0, 0)   # un-gridded: weights stay VMEM-resident
        weight_inputs = []
        weight_specs = []
        for w_t, b_p in self._padded_params:
            weight_inputs.append(w_t)
            weight_inputs.append(b_p)
            if single_buffer_weights:
                # Constant block index -> double-buffering buys nothing; halve VMEM.
                weight_specs.append(
                    pl.BlockSpec(w_t.shape, const_map, pipeline_mode=pl.Buffered(1)))
                weight_specs.append(
                    pl.BlockSpec(b_p.shape, const_map, pipeline_mode=pl.Buffered(1)))
            else:
                weight_specs.append(pl.BlockSpec(w_t.shape, const_map))
                weight_specs.append(pl.BlockSpec(b_p.shape, const_map))

        weight_bytes = sum(int(a.size) * a.dtype.itemsize for a in weight_inputs)
        buf_factor = 1 if single_buffer_weights else 2
        # activations: double-buffered x/out tiles + in-flight intermediates
        act_bytes = 2 * tile_b * (self.n + 2 * self._dim_pad + self._m_pad) * 4
        est_vmem = buf_factor * weight_bytes + 2 * act_bytes
        # Explicit limit sized for v7x (64 MiB physical); plenty on v5e/v6e (128 MiB).
        vmem_limit = int(min(64 * 1024 * 1024, max(32 * 1024 * 1024, 2 * est_vmem)))

        flops = 2 * B_pad * sum(int(w.shape[0]) * int(w.shape[1])
                                for w, _ in self._padded_params)
        bytes_accessed = (4 * B_pad * self.n + weight_bytes + 4 * B_pad * self._m_pad)
        transcendentals = B_pad * self._m_pad

        return pl.pallas_call(
            kernel,
            out_shape=jax.ShapeDtypeStruct((B_pad, self._m_pad), jnp.float32),
            grid=(B_pad // tile_b,),
            in_specs=[pl.BlockSpec((tile_b, self.n), lambda i: (i, 0))] + weight_specs,
            out_specs=pl.BlockSpec((tile_b, self._m_pad), lambda i: (i, 0)),
            compiler_params=pltpu.CompilerParams(
                dimension_semantics=("parallel",),
                vmem_limit_bytes=vmem_limit,
            ),
            cost_estimate=pl.CostEstimate(
                flops=flops,
                transcendentals=transcendentals,
                bytes_accessed=bytes_accessed,
            ),
        )(x, *weight_inputs)

    def __call__(self, state):
        x = jnp.asarray(state, jnp.float32)
        B = x.shape[0]

        b_aligned = _round_up(max(B, 1), _SUBLANE)
        if b_aligned >= 2 * _SUBLANE:
            # >=2 grid steps so the "parallel" batch axis shards across both
            # TensorCores on v7x; cap by max_batch_tile (256 default -> good MXU fill).
            tile_b = min(self._max_batch_tile,
                         _round_up((b_aligned + 1) // 2, _SUBLANE))
        else:
            tile_b = b_aligned
        B_pad = _round_up(B, tile_b)
        if B_pad != B:
            # Batch-only pad (no feature-dim pad); padded rows are sliced off below.
            x = jnp.pad(x, ((0, B_pad - B), (0, 0)))

        if self._single_buffered_ok is None:
            try:
                out_pad = jax.block_until_ready(
                    self._pallas_forward(x, B_pad, tile_b, True))
                self._single_buffered_ok = True
            except Exception:
                # Older JAX without BlockSpec(pipeline_mode=...) support: fall back
                # to default double-buffered weight blocks (correctness identical).
                self._single_buffered_ok = False
                out_pad = self._pallas_forward(x, B_pad, tile_b, False)
        else:
            out_pad = self._pallas_forward(x, B_pad, tile_b, self._single_buffered_ok)

        return out_pad[:B, : self.m]

    # ------------------------------------------------------------- reference
    def reference(self, state):
        """Pure-JAX reference using the same effective (weight_dtype-rounded) weights."""
        x = jnp.asarray(state, jnp.float32)
        for i in range(self.H):
            w, b = self.params[i]
            w = w.astype(self._weight_dtype).astype(jnp.float32)
            y = x @ w.T + b
            if i < self.H - 1:
                x = jnp.maximum(y, 0.0)
            else:
                return self._mid + self._half_range * jnp.tanh(y)


if __name__ == "__main__":
    key = jax.random.PRNGKey(0)
    k_params, k_state, k_state2 = jax.random.split(key, 3)

    # Small, forward-consistent shapes.
    B, n, m, dim, H = 8, 16, 4, 32, 3
    action_max, action_min = 2.0, -2.0

    actor = Actor(n, m, dim, H, action_max, action_min, k_params)
    state = jax.random.normal(k_state, (B, n), jnp.float32)

    out = jax.block_until_ready(actor(state))
    ref = actor.reference(state)
    assert out.shape == (B, m)
    assert jnp.allclose(out, ref, atol=1e-5, rtol=1e-5)

    # Ragged batch -> batch-only padding + a 2-step "parallel" grid (dual-TC on v7x).
    B2 = 20
    state2 = jax.random.normal(k_state2, (B2, n), jnp.float32)
    out2 = jax.block_until_ready(actor(state2))
    ref2 = actor.reference(state2)
    assert out2.shape == (B2, m)
    assert jnp.allclose(out2, ref2, atol=1e-5, rtol=1e-5)

    # bf16-resident-weight variant (halved weight HBM/VMEM, f32 accumulate/activations).
    actor_bf16 = Actor(n, m, dim, H, action_max, action_min, k_params,
                       weight_dtype=jnp.bfloat16)
    out3 = jax.block_until_ready(actor_bf16(state))
    ref3 = actor_bf16.reference(state)
    assert out3.shape == (B, m)
    assert jnp.allclose(out3, ref3, atol=1e-4, rtol=1e-4)

    print("KERNEL_OK")
</pallas_src>

<mosaic_0001>
module attributes {stable_mosaic.version = 11 : i64} {
  func.func @_fused_mlp_kernel(%arg0: i32, %arg1: memref<8x16xf32, #tpu.memory_space<vmem>>, %arg2: memref<16x128xf32, #tpu.memory_space<vmem>>, %arg3: memref<1x128xf32, #tpu.memory_space<vmem>>, %arg4: memref<128x128xf32, #tpu.memory_space<vmem>>, %arg5: memref<1x128xf32, #tpu.memory_space<vmem>>, %arg6: memref<128x128xf32, #tpu.memory_space<vmem>>, %arg7: memref<1x128xf32, #tpu.memory_space<vmem>>, %arg8: memref<8x128xf32, #tpu.memory_space<vmem>>) attributes {dimension_semantics = [#tpu.dimension_semantics<parallel>], iteration_bounds = array<i64: 1>, scalar_prefetch = 0 : i64, scratch_operands = 0 : i64, tpu.core_type = #tpu.core_type<tc>, window_params = [{transform_indices = @transform_0, window_bounds = array<i64: 8, 16>}, {pipeline_mode = #tpu.pipeline_mode<synchronous>, transform_indices = @transform_1, window_bounds = array<i64: 16, 128>}, {pipeline_mode = #tpu.pipeline_mode<synchronous>, transform_indices = @transform_2, window_bounds = array<i64: 1, 128>}, {pipeline_mode = #tpu.pipeline_mode<synchronous>, transform_indices = @transform_3, window_bounds = array<i64: 128, 128>}, {pipeline_mode = #tpu.pipeline_mode<synchronous>, transform_indices = @transform_4, window_bounds = array<i64: 1, 128>}, {pipeline_mode = #tpu.pipeline_mode<synchronous>, transform_indices = @transform_5, window_bounds = array<i64: 128, 128>}, {pipeline_mode = #tpu.pipeline_mode<synchronous>, transform_indices = @transform_6, window_bounds = array<i64: 1, 128>}, {transform_indices = @transform_7, window_bounds = array<i64: 8, 128>}]} {
    %c0 = arith.constant 0 : index
    %c0_0 = arith.constant 0 : index
    %0 = vector.load %arg1[%c0, %c0_0] : memref<8x16xf32, #tpu.memory_space<vmem>>, vector<8x16xf32>
    %c0_1 = arith.constant 0 : index
    %c0_2 = arith.constant 0 : index
    %1 = vector.load %arg2[%c0_1, %c0_2] : memref<16x128xf32, #tpu.memory_space<vmem>>, vector<16x128xf32>
    %c0_3 = arith.constant 0 : index
    %c0_4 = arith.constant 0 : index
    %2 = vector.load %arg3[%c0_3, %c0_4] : memref<1x128xf32, #tpu.memory_space<vmem>>, vector<1x128xf32>
    %cst = arith.constant dense<0.000000e+00> : vector<8x128xf32>
    %3 = tpu.matmul %0, %1, %cst {dimension_numbers = #tpu.dot_dimension_numbers<[1], [0], [0], [1], [0, 0, 1, 1], [], []>} : vector<8x16xf32>, vector<16x128xf32>, vector<8x128xf32> -> vector<8x128xf32>
    %4 = vector.broadcast %2 : vector<1x128xf32> to vector<8x128xf32>
    %5 = arith.addf %3, %4 : vector<8x128xf32>
    %cst_5 = arith.constant 0.000000e+00 : f32
    %6 = vector.broadcast %cst_5 : f32 to vector<8x128xf32>
    %7 = arith.maximumf %5, %6 : vector<8x128xf32>
    %c0_6 = arith.constant 0 : index
    %c0_7 = arith.constant 0 : index
    %8 = vector.load %arg4[%c0_6, %c0_7] : memref<128x128xf32, #tpu.memory_space<vmem>>, vector<128x128xf32>
    %c0_8 = arith.constant 0 : index
    %c0_9 = arith.constant 0 : index
    %9 = vector.load %arg5[%c0_8, %c0_9] : memref<1x128xf32, #tpu.memory_space<vmem>>, vector<1x128xf32>
    %cst_10 = arith.constant dense<0.000000e+00> : vector<8x128xf32>
    %10 = tpu.matmul %7, %8, %cst_10 {dimension_numbers = #tpu.dot_dimension_numbers<[1], [0], [0], [1], [0, 0, 1, 1], [], []>} : vector<8x128xf32>, vector<128x128xf32>, vector<8x128xf32> -> vector<8x128xf32>
    %11 = vector.broadcast %9 : vector<1x128xf32> to vector<8x128xf32>
    %12 = arith.addf %10, %11 : vector<8x128xf32>
    %cst_11 = arith.constant 0.000000e+00 : f32
    %13 = vector.broadcast %cst_11 : f32 to vector<8x128xf32>
    %14 = arith.maximumf %12, %13 : vector<8x128xf32>
    %c0_12 = arith.constant 0 : index
    %c0_13 = arith.constant 0 : index
    %15 = vector.load %arg6[%c0_12, %c0_13] : memref<128x128xf32, #tpu.memory_space<vmem>>, vector<128x128xf32>
    %c0_14 = arith.constant 0 : index
    %c0_15 = arith.constant 0 : index
    %16 = vector.load %arg7[%c0_14, %c0_15] : memref<1x128xf32, #tpu.memory_space<vmem>>, vector<1x128xf32>
    %cst_16 = arith.constant dense<0.000000e+00> : vector<8x128xf32>
    %17 = tpu.matmul %14, %15, %cst_16 {dimension_numbers = #tpu.dot_dimension_numbers<[1], [0], [0], [1], [0, 0, 1, 1], [], []>} : vector<8x128xf32>, vector<128x128xf32>, vector<8x128xf32> -> vector<8x128xf32>
    %18 = vector.broadcast %16 : vector<1x128xf32> to vector<8x128xf32>
    %19 = arith.addf %17, %18 : vector<8x128xf32>
    %20 = math.tanh %19 : vector<8x128xf32>
    %cst_17 = arith.constant 2.000000e+00 : f32
    %21 = vector.broadcast %cst_17 : f32 to vector<8x128xf32>
    %22 = arith.mulf %21, %20 : vector<8x128xf32>
    %cst_18 = arith.constant 0.000000e+00 : f32
    %23 = vector.broadcast %cst_18 : f32 to vector<8x128xf32>
    %24 = arith.addf %23, %22 : vector<8x128xf32>
    %c0_19 = arith.constant 0 : index
    %c0_20 = arith.constant 0 : index
    %25 = vector.load %arg8[%c0_19, %c0_20] : memref<8x128xf32, #tpu.memory_space<vmem>>, vector<8x128xf32>
    tpu.vector_store %arg8[%c0_19, %c0_20], %24 {strides = array<i32>} : memref<8x128xf32, #tpu.memory_space<vmem>>, vector<8x128xf32>,
    return
  }
  func.func @transform_0(%arg0: i32) -> (i32, i32) {
    %c0_i32 = arith.constant 0 : i32
    %c0_i32_0 = arith.constant 0 : i32
    return %arg0, %c0_i32 : i32, i32
  }
  func.func @transform_1(%arg0: i32) -> (i32, i32) {
    %c0_i32 = arith.constant 0 : i32
    %c0_i32_0 = arith.constant 0 : i32
    %c0_i32_1 = arith.constant 0 : i32
    return %c0_i32, %c0_i32_0 : i32, i32
  }
  func.func @transform_2(%arg0: i32) -> (i32, i32) {
    %c0_i32 = arith.constant 0 : i32
    %c0_i32_0 = arith.constant 0 : i32
    %c0_i32_1 = arith.constant 0 : i32
    return %c0_i32, %c0_i32_0 : i32, i32
  }
  func.func @transform_3(%arg0: i32) -> (i32, i32) {
    %c0_i32 = arith.constant 0 : i32
    %c0_i32_0 = arith.constant 0 : i32
    %c0_i32_1 = arith.constant 0 : i32
    return %c0_i32, %c0_i32_0 : i32, i32
  }
  func.func @transform_4(%arg0: i32) -> (i32, i32) {
    %c0_i32 = arith.constant 0 : i32
    %c0_i32_0 = arith.constant 0 : i32
    %c0_i32_1 = arith.constant 0 : i32
    return %c0_i32, %c0_i32_0 : i32, i32
  }
  func.func @transform_5(%arg0: i32) -> (i32, i32) {
    %c0_i32 = arith.constant 0 : i32
    %c0_i32_0 = arith.constant 0 : i32
    %c0_i32_1 = arith.constant 0 : i32
    return %c0_i32, %c0_i32_0 : i32, i32
  }
  func.func @transform_6(%arg0: i32) -> (i32, i32) {
    %c0_i32 = arith.constant 0 : i32
    %c0_i32_0 = arith.constant 0 : i32
    %c0_i32_1 = arith.constant 0 : i32
    return %c0_i32, %c0_i32_0 : i32, i32
  }
  func.func @transform_7(%arg0: i32) -> (i32, i32) {
    %c0_i32 = arith.constant 0 : i32
    %c0_i32_0 = arith.constant 0 : i32
    return %arg0, %c0_i32 : i32, i32
  }
}

module attributes {stable_mosaic.version = 11 : i64} {
  func.func @_fused_mlp_kernel(%arg0: i32, %arg1: memref<8x16xf32, #tpu.memory_space<vmem>>, %arg2: memref<16x128xf32, #tpu.memory_space<vmem>>, %arg3: memref<1x128xf32, #tpu.memory_space<vmem>>, %arg4: memref<128x128xf32, #tpu.memory_space<vmem>>, %arg5: memref<1x128xf32, #tpu.memory_space<vmem>>, %arg6: memref<128x128xf32, #tpu.memory_space<vmem>>, %arg7: memref<1x128xf32, #tpu.memory_space<vmem>>, %arg8: memref<8x128xf32, #tpu.memory_space<vmem>>) attributes {dimension_semantics = [#tpu.dimension_semantics<parallel>], iteration_bounds = array<i64: 1>, scalar_prefetch = 0 : i64, scratch_operands = 0 : i64, tpu.core_type = #tpu.core_type<tc>, window_params = [{transform_indices = @transform_0, window_bounds = array<i64: 8, 16>}, {pipeline_mode = #tpu.pipeline_mode<synchronous>, transform_indices = @transform_1, window_bounds = array<i64: 16, 128>}, {pipeline_mode = #tpu.pipeline_mode<synchronous>, transform_indices = @transform_2, window_bounds = array<i64: 1, 128>}, {pipeline_mode = #tpu.pipeline_mode<synchronous>, transform_indices = @transform_3, window_bounds = array<i64: 128, 128>}, {pipeline_mode = #tpu.pipeline_mode<synchronous>, transform_indices = @transform_4, window_bounds = array<i64: 1, 128>}, {pipeline_mode = #tpu.pipeline_mode<synchronous>, transform_indices = @transform_5, window_bounds = array<i64: 128, 128>}, {pipeline_mode = #tpu.pipeline_mode<synchronous>, transform_indices = @transform_6, window_bounds = array<i64: 1, 128>}, {transform_indices = @transform_7, window_bounds = array<i64: 8, 128>}]} {
    %c0 = arith.constant 0 : index
    %c0_0 = arith.constant 0 : index
    %0 = vector.load %arg1[%c0, %c0_0] : memref<8x16xf32, #tpu.memory_space<vmem>>, vector<8x16xf32>
    %c0_1 = arith.constant 0 : index
    %c0_2 = arith.constant 0 : index
    %1 = vector.load %arg2[%c0_1, %c0_2] : memref<16x128xf32, #tpu.memory_space<vmem>>, vector<16x128xf32>
    %c0_3 = arith.constant 0 : index
    %c0_4 = arith.constant 0 : index
    %2 = vector.load %arg3[%c0_3, %c0_4] : memref<1x128xf32, #tpu.memory_space<vmem>>, vector<1x128xf32>
    %cst = arith.constant dense<0.000000e+00> : vector<8x128xf32>
    %3 = tpu.matmul %0, %1, %cst {dimension_numbers = #tpu.dot_dimension_numbers<[1], [0], [0], [1], [0, 0, 1, 1], [], []>} : vector<8x16xf32>, vector<16x128xf32>, vector<8x128xf32> -> vector<8x128xf32>
    %4 = vector.broadcast %2 : vector<1x128xf32> to vector<8x128xf32>
    %5 = arith.addf %3, %4 : vector<8x128xf32>
    %cst_5 = arith.constant 0.000000e+00 : f32
    %6 = vector.broadcast %cst_5 : f32 to vector<8x128xf32>
    %7 = arith.maximumf %5, %6 : vector<8x128xf32>
    %c0_6 = arith.constant 0 : index
    %c0_7 = arith.constant 0 : index
    %8 = vector.load %arg4[%c0_6, %c0_7] : memref<128x128xf32, #tpu.memory_space<vmem>>, vector<128x128xf32>
    %c0_8 = arith.constant 0 : index
    %c0_9 = arith.constant 0 : index
    %9 = vector.load %arg5[%c0_8, %c0_9] : memref<1x128xf32, #tpu.memory_space<vmem>>, vector<1x128xf32>
    %cst_10 = arith.constant dense<0.000000e+00> : vector<8x128xf32>
    %10 = tpu.matmul %7, %8, %cst_10 {dimension_numbers = #tpu.dot_dimension_numbers<[1], [0], [0], [1], [0, 0, 1, 1], [], []>} : vector<8x128xf32>, vector<128x128xf32>, vector<8x128xf32> -> vector<8x128xf32>
    %11 = vector.broadcast %9 : vector<1x128xf32> to vector<8x128xf32>
    %12 = arith.addf %10, %11 : vector<8x128xf32>
    %cst_11 = arith.constant 0.000000e+00 : f32
    %13 = vector.broadcast %cst_11 : f32 to vector<8x128xf32>
    %14 = arith.maximumf %12, %13 : vector<8x128xf32>
    %c0_12 = arith.constant 0 : index
    %c0_13 = arith.constant 0 : index
    %15 = vector.load %arg6[%c0_12, %c0_13] : memref<128x128xf32, #tpu.memory_space<vmem>>, vector<128x128xf32>
    %c0_14 = arith.constant 0 : index
    %c0_15 = arith.constant 0 : index
    %16 = vector.load %arg7[%c0_14, %c0_15] : memref<1x128xf32, #tpu.memory_space<vmem>>, vector<1x128xf32>
    %cst_16 = arith.constant dense<0.000000e+00> : vector<8x128xf32>
    %17 = tpu.matmul %14, %15, %cst_16 {dimension_numbers = #tpu.dot_dimension_numbers<[1], [0], [0], [1], [0, 0, 1, 1], [], []>} : vector<8x128xf32>, vector<128x128xf32>, vector<8x128xf32> -> vector<8x128xf32>
    %18 = vector.broadcast %16 : vector<1x128xf32> to vector<8x128xf32>
    %19 = arith.addf %17, %18 : vector<8x128xf32>
    %20 = math.tanh %19 : vector<8x128xf32>
    %cst_17 = arith.constant 2.000000e+00 : f32
    %21 = vector.broadcast %cst_17 : f32 to vector<8x128xf32>
    %22 = arith.mulf %21, %20 : vector<8x128xf32>
    %cst_18 = arith.constant 0.000000e+00 : f32
    %23 = vector.broadcast %cst_18 : f32 to vector<8x128xf32>
    %24 = arith.addf %23, %22 : vector<8x128xf32>
    %c0_19 = arith.constant 0 : index
    %c0_20 = arith.constant 0 : index
    %25 = vector.load %arg8[%c0_19, %c0_20] : memref<8x128xf32, #tpu.memory_space<vmem>>, vector<8x128xf32>
    tpu.vector_store %arg8[%c0_19, %c0_20], %24 {strides = array<i32>} : memref<8x128xf32, #tpu.memory_space<vmem>>, vector<8x128xf32>,
    return
  }
  func.func @transform_0(%arg0: i32) -> (i32, i32) {
    %c0_i32 = arith.constant 0 : i32
    %c0_i32_0 = arith.constant 0 : i32
    return %arg0, %c0_i32 : i32, i32
  }
  func.func @transform_1(%arg0: i32) -> (i32, i32) {
    %c0_i32 = arith.constant 0 : i32
    %c0_i32_0 = arith.constant 0 : i32
    %c0_i32_1 = arith.constant 0 : i32
    return %c0_i32, %c0_i32_0 : i32, i32
  }
  func.func @transform_2(%arg0: i32) -> (i32, i32) {
    %c0_i32 = arith.constant 0 : i32
    %c0_i32_0 = arith.constant 0 : i32
    %c0_i32_1 = arith.constant 0 : i32
    return %c0_i32, %c0_i32_0 : i32, i32
  }
  func.func @transform_3(%arg0: i32) -> (i32, i32) {
    %c0_i32 = arith.constant 0 : i32
    %c0_i32_0 = arith.constant 0 : i32
    %c0_i32_1 = arith.constant 0 : i32
    return %c0_i32, %c0_i32_0 : i32, i32
  }
  func.func @transform_4(%arg0: i32) -> (i32, i32) {
    %c0_i32 = arith.constant 0 : i32
    %c0_i32_0 = arith.constant 0 : i32
    %c0_i32_1 = arith.constant 0 : i32
    return %c0_i32, %c0_i32_0 : i32, i32
  }
  func.func @transform_5(%arg0: i32) -> (i32, i32) {
    %c0_i32 = arith.constant 0 : i32
    %c0_i32_0 = arith.constant 0 : i32
    %c0_i32_1 = arith.constant 0 : i32
    return %c0_i32, %c0_i32_0 : i32, i32
  }
  func.func @transform_6(%arg0: i32) -> (i32, i32) {
    %c0_i32 = arith.constant 0 : i32
    %c0_i32_0 = arith.constant 0 : i32
    %c0_i32_1 = arith.constant 0 : i32
    return %c0_i32, %c0_i32_0 : i32, i32
  }
  func.func @transform_7(%arg0: i32) -> (i32, i32) {
    %c0_i32 = arith.constant 0 : i32
    %c0_i32_0 = arith.constant 0 : i32
    return %arg0, %c0_i32 : i32, i32
  }
}

</mosaic_0001>

<bundles_post_ra>
// kernel: tpu_custom_call.1
= control target key start
LH: loop header
LB: loop body
LE: loop exit
PB: predicated region body
PF: predicated region fallthrough
CT: control target
= control target key end

     0   :  { %12 = vsyncpa [#allocation3], 0  ;;  %s820_s0 = inlined_call_operand.hbm [shape: f32[8,16], index: 0, kind: input, shape index: {}]   ;;  %s821_s1 = inlined_call_operand.hbm [shape: f32[16,128], index: 1, kind: input, shape index: {}]   ;;  %s822_s2 = inlined_call_operand.vmem [shape: f32[1,128], index: 2, kind: input, shape index: {}]   ;;  %s823_s3 = inlined_call_operand.hbm [shape: f32[128,128], index: 3, kind: input, shape index: {}]   ;;  %s824_s4 = inlined_call_operand.vmem [shape: f32[1,128], index: 4, kind: input, shape index: {}]   ;;  %s825_s5 = inlined_call_operand.hbm [shape: f32[128,128], index: 5, kind: input, shape index: {}]   ;;  %s826_s6 = inlined_call_operand.vmem [shape: f32[1,128], index: 6, kind: input, shape index: {}]   ;;  %s827_s7 = inlined_call_operand.hbm [shape: f32[8,128], index: 7, kind: output, shape index: {}]  }
   0x1   :  { %13 = vsyncpa [#allocation6], 0 }
   0x2   :  { %14 = vsyncpa [#allocation9], 0 }
   0x3   :  { %15 = vsyncpa [#allocation4], 0  ;;  %s672_s24 = smov [#allocation5]   ;;  %s554_s28 = scalar_lea.hbm %s821_s1, 256 }
   0x4   :  { %s31_s25 = sshll.u32 %s672_s24, 4  ;;  %p555_p0 = scmp.ne.s32.totalorder %s821_s1, %s554_s28  ;;  %s32_s25 = int_to_ptr.vmem [resolvable:$true] %s31_s25 }
   0x5   :  { %p558_p1 = scmp.lt.u32.totalorder %s554_s28, %s821_s1 }
   0x7   :  { %p560_p2 = pnand %p558_p1, %p555_p0 }
   0x9   :  { %563 = shalt.err (!%p560_p2)
}
   0xa   :  { %s564_s10 = scalar_lea.vmem %s32_s25, 256  ;;  %p569_p4 = scmp.lt.s32.totalorder %s32_s25, %s32_s25 }
   0xb   :  { %p565_p3 = scmp.ne.s32.totalorder %s32_s25, %s564_s10  ;;  %p570_p5 = scmp.lt.s32.totalorder %s564_s10, %s564_s10 }
   0xd   :  { %p571_p6 = por %p570_p5, %p569_p4 }
   0xf   :  { %p572_p7 = pnand %p571_p6, %p565_p3 }
  0x11   :  { %575 = shalt.err (!%p572_p7)
}
  0x12   :  { %s673_s11 = smov 128   ;;  %s674_s12 = smov 8  }
  0x13   :  { %37 = dma.hbm_to_vmem [thread:$0]  %s821_s1, 256, %s32_s25, [#allocation6], %s673_s11, %s673_s11, %s674_s12  }
  0x14   :  { %s675_s15 = smov [#allocation2]   ;;  %s676_s17 = smov [#allocation7]  }
  0x15   :  { %s22_s16 = sshll.u32 %s675_s15, 4  ;;  %s45_s18 = sshll.u32 %s676_s17, 4  ;;  %s23_s16 = int_to_ptr.vmem [resolvable:$true] %s22_s16  ;;  %s46_s18 = int_to_ptr.vmem [resolvable:$true] %s45_s18 }
  0x16   :  { %s576_s21 = scalar_lea.hbm %s820_s0, 128 }
  0x17   :  { %p577_p8 = scmp.ne.s32.totalorder %s820_s0, %s576_s21  ;;  %p580_p9 = scmp.lt.u32.totalorder %s576_s21, %s820_s0 }
  0x19   :  { %p582_p10 = pnand %p580_p9, %p577_p8 }
  0x1b   :  { %585 = shalt.err (!%p582_p10)
}
  0x1c   :  { %s586_s1 = scalar_lea.vmem %s23_s16, 128  ;;  %p591_p12 = scmp.lt.s32.totalorder %s23_s16, %s23_s16 }
  0x1d   :  { %p587_p11 = scmp.ne.s32.totalorder %s23_s16, %s586_s1  ;;  %p592_p13 = scmp.lt.s32.totalorder %s586_s1, %s586_s1 }
  0x1f   :  { %p593_p0 = por %p592_p13, %p591_p12 }
  0x21   :  { %p594_p1 = pnand %p593_p0, %p587_p11 }
  0x23   :  { %597 = shalt.err (!%p594_p1)
}
  0x24   :  { %25 = dma.hbm_to_vmem [thread:$0]  %s820_s0, 128, %s23_s16, [#allocation3]  }
  0x25   :  { %s598_s30 = scalar_lea.hbm %s823_s3, 2048 }
  0x26   :  { %p599_p2 = scmp.ne.s32.totalorder %s823_s3, %s598_s30  ;;  %p602_p3 = scmp.lt.u32.totalorder %s598_s30, %s823_s3 }
  0x28   :  { %p604_p4 = pnand %p602_p3, %p599_p2 }
  0x2a   :  { %607 = shalt.err (!%p604_p4)
}
  0x2b   :  { %s608_s14 = scalar_lea.vmem %s46_s18, 2048  ;;  %p613_p6 = scmp.lt.s32.totalorder %s46_s18, %s46_s18 }
  0x2c   :  { %p609_p5 = scmp.ne.s32.totalorder %s46_s18, %s608_s14  ;;  %p614_p7 = scmp.lt.s32.totalorder %s608_s14, %s608_s14 }
  0x2e   :  { %p615_p8 = por %p614_p7, %p613_p6 }
  0x30   :  { %p616_p9 = pnand %p615_p8, %p609_p5 }
  0x32   :  { %619 = shalt.err (!%p616_p9)
}
  0x33   :  { %51 = dma.hbm_to_vmem [thread:$0]  %s823_s3, 2048, %s46_s18, [#allocation6], %s673_s11, %s673_s11, %s674_s12  }
  0x34   :  { %s677_s16 = smov [#allocation8]   ;;  %s620_s21 = scalar_lea.hbm %s825_s5, 2048 }
  0x35   :  { %s59_s17 = sshll.u32 %s677_s16, 4  ;;  %p621_p10 = scmp.ne.s32.totalorder %s825_s5, %s620_s21  ;;  %s60_s17 = int_to_ptr.vmem [resolvable:$true] %s59_s17 }
  0x36   :  { %p624_p11 = scmp.lt.u32.totalorder %s620_s21, %s825_s5 }
  0x38   :  { %p626_p12 = pnand %p624_p11, %p621_p10 }
  0x3a   :  { %629 = shalt.err (!%p626_p12)
}
  0x3b   :  { %s630_s1 = scalar_lea.vmem %s60_s17, 2048  ;;  %p635_p0 = scmp.lt.s32.totalorder %s60_s17, %s60_s17 }
  0x3c   :  { %p631_p13 = scmp.ne.s32.totalorder %s60_s17, %s630_s1  ;;  %p636_p1 = scmp.lt.s32.totalorder %s630_s1, %s630_s1 }
  0x3e   :  { %p637_p2 = por %p636_p1, %p635_p0 }
  0x40   :  { %p638_p3 = pnand %p637_p2, %p631_p13 }
  0x42   :  { %641 = shalt.err (!%p638_p3)
}
  0x43   :  { %65 = dma.hbm_to_vmem [thread:$0]  %s825_s5, 2048, %s60_s17, [#allocation9], %s673_s11, %s673_s11, %s674_s12  }
  0x44   :  { %664 = dma.done.wait [#allocation3], 128  }
  0x45   :  { %665 = vsyncadd [#allocation3], 4294967168 }
  0x46   :  { %666 = dma.done.wait [#allocation6], 2304  }
  0x47   :  { %667 = vsyncadd [#allocation6], 4294964992 }
  0x48   :  { %668 = dma.done.wait [#allocation9], 2048  }
  0x49   :  { %669 = vsyncadd [#allocation9], 4294965248  ;;  %v678_v0 = vmov 0.0|0.0   ;;  %vm679_vm0 = vmmov 0   ;;  %v680_v1 = vmov 0.0   ;;  %v81_v2 = vld [vmem:[#allocation5] sm:$0xff] }
  0x4a   :  { %491 = vmatprep.subr.bf16.mxu0 %v678_v0  ;;  %418 = vmatprep.mubr.msk.f32.mxu0 %vm679_vm0, %v680_v1  ;;  %v82_v3 = vld [vmem:[#allocation5 + $0x8] sm:$0xff]  ;;  %v165_v5 = vld [vmem:[#allocation7] sm:$0xff]  ;;  %v166_v6 = vld [vmem:[#allocation7 + $0x8] sm:$0xff]  ;;  %vm90_vm1 = vcmask 130048   ;;  %s681_s28 = smov [#allocation10]  }
  0x4b   :  { %494 = vmatprep.subr.bf16.mxu1 %v678_v0  ;;  %453 = vmatprep.mubr.msk.f32.mxu1 %vm679_vm0, %v680_v1  ;;  %v492_v4 = vpack.c.bf16 %v82_v3, %v81_v2  ;;  %v167_v7 = vld [vmem:[#allocation7 + $0x10] sm:$0xff]  ;;  %v495_v8 = vpack.c.bf16 %v166_v6, %v165_v5  ;;  %v168_v9 = vld [vmem:[#allocation7 + $0x18] sm:$0xff]  ;;  %v80_v10 = vld [vmem:[#allocation2] sm:$0xff]  ;;  %s362_s29 = sshll.u32 %s681_s28, 4  ;;  %s363_s29 = int_to_ptr.vmem [resolvable:$true] %s362_s29 }
  0x4c   :  { %v498_v11 = vpack.c.bf16 %v168_v9, %v167_v7  ;;  %v169_v12 = vld [vmem:[#allocation7 + $0x20] sm:$0xff]  ;;  %v170_v13 = vld [vmem:[#allocation7 + $0x28] sm:$0xff]  ;;  %v171_v15 = vld [vmem:[#allocation7 + $0x30] sm:$0xff]  ;;  %p647_p5 = scmp.lt.s32.totalorder %s363_s29, %s363_s29 }
  0x4d   :  { %493 = vmatpush3.bf16.msra.mxu0 %v492_v4  ;;  %496 = vmatpush3.bf16.msra.mxu1 %v495_v8  ;;  %v501_v14 = vpack.c.bf16 %v170_v13, %v169_v12  ;;  %v172_v16 = vld [vmem:[#allocation7 + $0x38] sm:$0xff]  ;;  %v173_v18 = vld [vmem:[#allocation7 + $0x40] sm:$0xff]  ;;  %v174_v19 = vld [vmem:[#allocation7 + $0x48] sm:$0xff] }
  0x4e   :  { %518 = vmatprep.subr.bf16.mxu0 %v678_v0  ;;  %497 = vmatprep.subr.bf16.mxu1 %v678_v0  ;;  %v504_v17 = vpack.c.bf16 %v172_v16, %v171_v15  ;;  %v507_v20 = vpack.c.bf16 %v174_v19, %v173_v18  ;;  %v175_v21 = vld [vmem:[#allocation7 + $0x50] sm:$0xff]  ;;  %v176_v22 = vld [vmem:[#allocation7 + $0x58] sm:$0xff]  ;;  %v177_v24 = vld [vmem:[#allocation7 + $0x60] sm:$0xff] }
  0x4f   :  { %v510_v23 = vpack.c.bf16 %v176_v22, %v175_v21  ;;  %v178_v25 = vld [vmem:[#allocation7 + $0x68] sm:$0xff]  ;;  %v179_v27 = vld [vmem:[#allocation7 + $0x70] sm:$0xff]  ;;  %v180_v28 = vld [vmem:[#allocation7 + $0x78] sm:$0xff] }
  0x50   :  { %419 = vmatmul.mubr.msk.f32.vlgmr.msra.gmra.mrb[0].mxu0 %vm90_vm1, %v80_v10  ;;  %v513_v26 = vpack.c.bf16 %v178_v25, %v177_v24  ;;  %v516_v29 = vpack.c.bf16 %v180_v28, %v179_v27  ;;  %v259_v30 = vld [vmem:[#allocation8] sm:$0xff]  ;;  %v260_v31 = vld [vmem:[#allocation8 + $0x8] sm:$0xff]  ;;  %v261_v32 = vld [vmem:[#allocation8 + $0x10] sm:$0xff] }
  0x51   :  { %488 = vmatprep.mubr.msk.f32.mxu0 %vm679_vm0, %v680_v1  ;;  %499 = vmatpush3.bf16.msra.mxu1 %v498_v11  ;;  %v519_v33 = vpack.c.bf16 %v260_v31, %v259_v30  ;;  %v262_v34 = vld [vmem:[#allocation8 + $0x18] sm:$0xff]  ;;  %v263_v36 = vld [vmem:[#allocation8 + $0x20] sm:$0xff]  ;;  %v264_v37 = vld [vmem:[#allocation8 + $0x28] sm:$0xff] }
  0x52   :  { %500 = vmatprep.subr.bf16.mxu1 %v678_v0  ;;  %v522_v35 = vpack.c.bf16 %v262_v34, %v261_v32  ;;  %v525_v38 = vpack.c.bf16 %v264_v37, %v263_v36  ;;  %v265_v39 = vld [vmem:[#allocation8 + $0x30] sm:$0xff]  ;;  %v266_v40 = vld [vmem:[#allocation8 + $0x38] sm:$0xff]  ;;  %v267_v42 = vld [vmem:[#allocation8 + $0x40] sm:$0xff] }
  0x53   :  { %520 = vmatpush3.bf16.msra.mxu0 %v519_v33  ;;  %v528_v41 = vpack.c.bf16 %v266_v40, %v265_v39  ;;  %v268_v43 = vld [vmem:[#allocation8 + $0x48] sm:$0xff]  ;;  %v269_v45 = vld [vmem:[#allocation8 + $0x50] sm:$0xff]  ;;  %v270_v46 = vld [vmem:[#allocation8 + $0x58] sm:$0xff] }
  0x54   :  { %521 = vmatprep.subr.bf16.mxu0 %v678_v0  ;;  %v531_v44 = vpack.c.bf16 %v268_v43, %v267_v42  ;;  %v534_v47 = vpack.c.bf16 %v270_v46, %v269_v45  ;;  %v271_v48 = vld [vmem:[#allocation8 + $0x60] sm:$0xff]  ;;  %v272_v49 = vld [vmem:[#allocation8 + $0x68] sm:$0xff]  ;;  %v273_v56 = vld [vmem:[#allocation8 + $0x70] sm:$0xff] }
  0x55   :  { %502 = vmatpush3.bf16.msra.mxu1 %v501_v14  ;;  %v537_v50 = vpack.c.bf16 %v272_v49, %v271_v48  ;;  %v373_v51 = vld [vmem:[%s822_s2] ss:$0 sm:$0xff]  ;;  %v274_v57 = vld [vmem:[#allocation8 + $0x78] sm:$0xff] }
  0x56   :  { %503 = vmatprep.subr.bf16.mxu1 %v678_v0  ;;  %v540_v58 = vpack.c.bf16 %v274_v57, %v273_v56  ;;  %v375_v59 = vld [vmem:[%s824_s4] ss:$0 sm:$0xff]  ;;  %s642_s4 = scalar_lea.vmem %s363_s29, 128 }
  0x57   :  { %523 = vmatpush3.bf16.msra.mxu0 %v522_v35  ;;  %p643_p4 = scmp.ne.s32.totalorder %s363_s29, %s642_s4  ;;  %p648_p6 = scmp.lt.s32.totalorder %s642_s4, %s642_s4 }
  0x58   :  { %524 = vmatprep.subr.bf16.mxu0 %v678_v0 }
  0x59   :  { %505 = vmatpush3.bf16.msra.mxu1 %v504_v17  ;;  %p649_p7 = por %p648_p6, %p647_p5 }
  0x5a   :  { %506 = vmatprep.subr.bf16.mxu1 %v678_v0 }
  0x5b   :  { %526 = vmatpush3.bf16.msra.mxu0 %v525_v38  ;;  %p650_p8 = pnand %p649_p7, %p643_p4 }
  0x5c   :  { %527 = vmatprep.subr.bf16.mxu0 %v678_v0 }
  0x5d   :  { %508 = vmatpush3.bf16.msra.mxu1 %v507_v20 }
  0x5e   :  { %509 = vmatprep.subr.bf16.mxu1 %v678_v0 }
  0x5f   :  { %529 = vmatpush3.bf16.msra.mxu0 %v528_v41 }
  0x60   :  { %530 = vmatprep.subr.bf16.mxu0 %v678_v0 }
  0x61   :  { %511 = vmatpush3.bf16.msra.mxu1 %v510_v23 }
  0x62   :  { %512 = vmatprep.subr.bf16.mxu1 %v678_v0 }
  0x63   :  { %532 = vmatpush3.bf16.msra.mxu0 %v531_v44 }
  0x64   :  { %533 = vmatprep.subr.bf16.mxu0 %v678_v0 }
  0x65   :  { %514 = vmatpush3.bf16.msra.mxu1 %v513_v26 }
  0x66   :  { %515 = vmatprep.subr.bf16.mxu1 %v678_v0 }
  0x67   :  { %535 = vmatpush3.bf16.msra.mxu0 %v534_v47 }
  0x68   :  { %536 = vmatprep.subr.bf16.mxu0 %v678_v0 }
  0x69   :  { %517 = vmatpush3.bf16.msra.mxu1 %v516_v29 }
  0x6b   :  { %538 = vmatpush3.bf16.msra.mxu0 %v537_v50 }
  0x6c   :  { %539 = vmatprep.subr.bf16.mxu0 %v678_v0  ;;  %v376_v0 = vld [vmem:[%s826_s6] ss:$0 sm:$0xff] }
  0x6f   :  { %541 = vmatpush3.bf16.msra.mxu0 %v540_v58 }
 0x123   :  { %v160_v52 = vpop.f32.mrb[0].mxu0 }
 0x124   :  { %v161_v53 = vadd.f32 %v373_v51, %v160_v52  ;;  %v420_v54 = vpop.f32.mrb[1].mxu0 }
 0x126   :  { %v164_v55 = vmax.f32 %v161_v53, 0.0 }
 0x128   :  { %454 = vmatmul.mubr.f32.vlgmr.msra.gmra.mrb[0].mxu1 %v164_v55 }
 0x1fb   :  { %v254_v60 = vpop.f32.mrb[0].mxu1 }
 0x1fc   :  { %v255_v61 = vadd.f32 %v375_v59, %v254_v60  ;;  %v455_v62 = vpop.f32.mrb[1].mxu1 }
 0x1fe   :  { %v258_v63 = vmax.f32 %v255_v61, 0.0 }
 0x200   :  { %489 = vmatmul.mubr.f32.vlgmr.msra.gmra.mrb[2].mxu0 %v258_v63 }
 0x2d3   :  { %v348_v1 = vpop.f32.mrb[2].mxu0 }
 0x2d4   :  { %v349_v2 = vadd.f32 %v376_v0, %v348_v1  ;;  %v490_v3 = vpop.f32.mrb[3].mxu0 }
 0x2d6   :  { %552 = vtanh.f32 %v349_v2 }
 0x2e0   :  { %v553_v4 = vpop.eup %552 }
 0x2e1   :  { %v353_v5 = vmul.f32 2.0, %v553_v4 }
 0x2e3   :  { %355 = vst [vmem:[#allocation10] sm:$0xff] %v353_v5 }
 0x2e4   :  { %653 = shalt.err (!%p650_p8)
}
 0x2e5   :  { %s654_s6 = scalar_lea.hbm %s827_s7, 128 }
 0x2e6   :  { %p655_p9 = scmp.ne.s32.totalorder %s827_s7, %s654_s6  ;;  %p658_p10 = scmp.lt.u32.totalorder %s654_s6, %s827_s7 }
 0x2e8   :  { %p660_p11 = pnand %p658_p10, %p655_p9 }
 0x2ea   :  { %663 = shalt.err (!%p660_p11)
}
 0x2eb   :  { %365 = dma.vmem_to_hbm [thread:$0]  %s363_s29, 128, %s827_s7, [#allocation4]  }
 0x2ec   :  { %670 = dma.done.wait [#allocation4], 128  }
 0x2ed   :  { %671 = vsyncadd [#allocation4], 4294967168 }
 0x2ee   :  { %369 = vsyncpa [#allocation3], 1 }
 0x2ef   :  { %370 = vsyncpa [#allocation6], 1 }
 0x2f0   :  { %371 = vsyncpa [#allocation9], 1 }
 0x2f1   :  { %372 = vsyncpa [#allocation4], 1 }

// kernel: tpu_custom_call.1
= control target key start
LH: loop header
LB: loop body
LE: loop exit
PB: predicated region body
PF: predicated region fallthrough
CT: control target
= control target key end

     0   :  { %12 = vsyncpa [#allocation3], 0  ;;  %s820_s0 = inlined_call_operand.hbm [shape: f32[8,16], index: 0, kind: input, shape index: {}]   ;;  %s821_s1 = inlined_call_operand.hbm [shape: f32[16,128], index: 1, kind: input, shape index: {}]   ;;  %s822_s2 = inlined_call_operand.vmem [shape: f32[1,128], index: 2, kind: input, shape index: {}]   ;;  %s823_s3 = inlined_call_operand.hbm [shape: f32[128,128], index: 3, kind: input, shape index: {}]   ;;  %s824_s4 = inlined_call_operand.vmem [shape: f32[1,128], index: 4, kind: input, shape index: {}]   ;;  %s825_s5 = inlined_call_operand.hbm [shape: f32[128,128], index: 5, kind: input, shape index: {}]   ;;  %s826_s6 = inlined_call_operand.vmem [shape: f32[1,128], index: 6, kind: input, shape index: {}]   ;;  %s827_s7 = inlined_call_operand.hbm [shape: f32[8,128], index: 7, kind: output, shape index: {}]  }
   0x1   :  { %13 = vsyncpa [#allocation6], 0 }
   0x2   :  { %14 = vsyncpa [#allocation9], 0 }
   0x3   :  { %15 = vsyncpa [#allocation4], 0  ;;  %s672_s24 = smov [#allocation5]   ;;  %s554_s28 = scalar_lea.hbm %s821_s1, 256 }
   0x4   :  { %s31_s25 = sshll.u32 %s672_s24, 4  ;;  %p555_p0 = scmp.ne.s32.totalorder %s821_s1, %s554_s28  ;;  %s32_s25 = int_to_ptr.vmem [resolvable:$true] %s31_s25 }
   0x5   :  { %p558_p1 = scmp.lt.u32.totalorder %s554_s28, %s821_s1 }
   0x7   :  { %p560_p2 = pnand %p558_p1, %p555_p0 }
   0x9   :  { %563 = shalt.err (!%p560_p2)
}
   0xa   :  { %s564_s10 = scalar_lea.vmem %s32_s25, 256  ;;  %p569_p4 = scmp.lt.s32.totalorder %s32_s25, %s32_s25 }
   0xb   :  { %p565_p3 = scmp.ne.s32.totalorder %s32_s25, %s564_s10  ;;  %p570_p5 = scmp.lt.s32.totalorder %s564_s10, %s564_s10 }
   0xd   :  { %p571_p6 = por %p570_p5, %p569_p4 }
   0xf   :  { %p572_p7 = pnand %p571_p6, %p565_p3 }
  0x11   :  { %575 = shalt.err (!%p572_p7)
}
  0x12   :  { %s673_s11 = smov 128   ;;  %s674_s12 = smov 8  }
  0x13   :  { %37 = dma.hbm_to_vmem [thread:$0]  %s821_s1, 256, %s32_s25, [#allocation6], %s673_s11, %s673_s11, %s674_s12  }
  0x14   :  { %s675_s15 = smov [#allocation2]   ;;  %s676_s17 = smov [#allocation7]  }
  0x15   :  { %s22_s16 = sshll.u32 %s675_s15, 4  ;;  %s45_s18 = sshll.u32 %s676_s17, 4  ;;  %s23_s16 = int_to_ptr.vmem [resolvable:$true] %s22_s16  ;;  %s46_s18 = int_to_ptr.vmem [resolvable:$true] %s45_s18 }
  0x16   :  { %s576_s21 = scalar_lea.hbm %s820_s0, 128 }
  0x17   :  { %p577_p8 = scmp.ne.s32.totalorder %s820_s0, %s576_s21  ;;  %p580_p9 = scmp.lt.u32.totalorder %s576_s21, %s820_s0 }
  0x19   :  { %p582_p10 = pnand %p580_p9, %p577_p8 }
  0x1b   :  { %585 = shalt.err (!%p582_p10)
}
  0x1c   :  { %s586_s1 = scalar_lea.vmem %s23_s16, 128  ;;  %p591_p12 = scmp.lt.s32.totalorder %s23_s16, %s23_s16 }
  0x1d   :  { %p587_p11 = scmp.ne.s32.totalorder %s23_s16, %s586_s1  ;;  %p592_p13 = scmp.lt.s32.totalorder %s586_s1, %s586_s1 }
  0x1f   :  { %p593_p0 = por %p592_p13, %p591_p12 }
  0x21   :  { %p594_p1 = pnand %p593_p0, %p587_p11 }
  0x23   :  { %597 = shalt.err (!%p594_p1)
}
  0x24   :  { %25 = dma.hbm_to_vmem [thread:$0]  %s820_s0, 128, %s23_s16, [#allocation3]  }
  0x25   :  { %s598_s30 = scalar_lea.hbm %s823_s3, 2048 }
  0x26   :  { %p599_p2 = scmp.ne.s32.totalorder %s823_s3, %s598_s30  ;;  %p602_p3 = scmp.lt.u32.totalorder %s598_s30, %s823_s3 }
  0x28   :  { %p604_p4 = pnand %p602_p3, %p599_p2 }
  0x2a   :  { %607 = shalt.err (!%p604_p4)
}
  0x2b   :  { %s608_s14 = scalar_lea.vmem %s46_s18, 2048  ;;  %p613_p6 = scmp.lt.s32.totalorder %s46_s18, %s46_s18 }
  0x2c   :  { %p609_p5 = scmp.ne.s32.totalorder %s46_s18, %s608_s14  ;;  %p614_p7 = scmp.lt.s32.totalorder %s608_s14, %s608_s14 }
  0x2e   :  { %p615_p8 = por %p614_p7, %p613_p6 }
  0x30   :  { %p616_p9 = pnand %p615_p8, %p609_p5 }
  0x32   :  { %619 = shalt.err (!%p616_p9)
}
  0x33   :  { %51 = dma.hbm_to_vmem [thread:$0]  %s823_s3, 2048, %s46_s18, [#allocation6], %s673_s11, %s673_s11, %s674_s12  }
  0x34   :  { %s677_s16 = smov [#allocation8]   ;;  %s620_s21 = scalar_lea.hbm %s825_s5, 2048 }
  0x35   :  { %s59_s17 = sshll.u32 %s677_s16, 4  ;;  %p621_p10 = scmp.ne.s32.totalorder %s825_s5, %s620_s21  ;;  %s60_s17 = int_to_ptr.vmem [resolvable:$true] %s59_s17 }
  0x36   :  { %p624_p11 = scmp.lt.u32.totalorder %s620_s21, %s825_s5 }
  0x38   :  { %p626_p12 = pnand %p624_p11, %p621_p10 }
  0x3a   :  { %629 = shalt.err (!%p626_p12)
}
  0x3b   :  { %s630_s1 = scalar_lea.vmem %s60_s17, 2048  ;;  %p635_p0 = scmp.lt.s32.totalorder %s60_s17, %s60_s17 }
  0x3c   :  { %p631_p13 = scmp.ne.s32.totalorder %s60_s17, %s630_s1  ;;  %p636_p1 = scmp.lt.s32.totalorder %s630_s1, %s630_s1 }
  0x3e   :  { %p637_p2 = por %p636_p1, %p635_p0 }
  0x40   :  { %p638_p3 = pnand %p637_p2, %p631_p13 }
  0x42   :  { %641 = shalt.err (!%p638_p3)
}
  0x43   :  { %65 = dma.hbm_to_vmem [thread:$0]  %s825_s5, 2048, %s60_s17, [#allocation9], %s673_s11, %s673_s11, %s674_s12  }
  0x44   :  { %664 = dma.done.wait [#allocation3], 128  }
  0x45   :  { %665 = vsyncadd [#allocation3], 4294967168 }
  0x46   :  { %666 = dma.done.wait [#allocation6], 2304  }
  0x47   :  { %667 = vsyncadd [#allocation6], 4294964992 }
  0x48   :  { %668 = dma.done.wait [#allocation9], 2048  }
  0x49   :  { %669 = vsyncadd [#allocation9], 4294965248  ;;  %v678_v0 = vmov 0.0|0.0   ;;  %vm679_vm0 = vmmov 0   ;;  %v680_v1 = vmov 0.0   ;;  %v81_v2 = vld [vmem:[#allocation5] sm:$0xff] }
  0x4a   :  { %491 = vmatprep.subr.bf16.mxu0 %v678_v0  ;;  %418 = vmatprep.mubr.msk.f32.mxu0 %vm679_vm0, %v680_v1  ;;  %v82_v3 = vld [vmem:[#allocation5 + $0x8] sm:$0xff]  ;;  %v165_v5 = vld [vmem:[#allocation7] sm:$0xff]  ;;  %v166_v6 = vld [vmem:[#allocation7 + $0x8] sm:$0xff]  ;;  %vm90_vm1 = vcmask 130048   ;;  %s681_s28 = smov [#allocation10]  }
  0x4b   :  { %494 = vmatprep.subr.bf16.mxu1 %v678_v0  ;;  %453 = vmatprep.mubr.msk.f32.mxu1 %vm679_vm0, %v680_v1  ;;  %v492_v4 = vpack.c.bf16 %v82_v3, %v81_v2  ;;  %v167_v7 = vld [vmem:[#allocation7 + $0x10] sm:$0xff]  ;;  %v495_v8 = vpack.c.bf16 %v166_v6, %v165_v5  ;;  %v168_v9 = vld [vmem:[#allocation7 + $0x18] sm:$0xff]  ;;  %v80_v10 = vld [vmem:[#allocation2] sm:$0xff]  ;;  %s362_s29 = sshll.u32 %s681_s28, 4  ;;  %s363_s29 = int_to_ptr.vmem [resolvable:$true] %s362_s29 }
  0x4c   :  { %v498_v11 = vpack.c.bf16 %v168_v9, %v167_v7  ;;  %v169_v12 = vld [vmem:[#allocation7 + $0x20] sm:$0xff]  ;;  %v170_v13 = vld [vmem:[#allocation7 + $0x28] sm:$0xff]  ;;  %v171_v15 = vld [vmem:[#allocation7 + $0x30] sm:$0xff]  ;;  %p647_p5 = scmp.lt.s32.totalorder %s363_s29, %s363_s29 }
  0x4d   :  { %493 = vmatpush3.bf16.msra.mxu0 %v492_v4  ;;  %496 = vmatpush3.bf16.msra.mxu1 %v495_v8  ;;  %v501_v14 = vpack.c.bf16 %v170_v13, %v169_v12  ;;  %v172_v16 = vld [vmem:[#allocation7 + $0x38] sm:$0xff]  ;;  %v173_v18 = vld [vmem:[#allocation7 + $0x40] sm:$0xff]  ;;  %v174_v19 = vld [vmem:[#allocation7 + $0x48] sm:$0xff] }
  0x4e   :  { %518 = vmatprep.subr.bf16.mxu0 %v678_v0  ;;  %497 = vmatprep.subr.bf16.mxu1 %v678_v0  ;;  %v504_v17 = vpack.c.bf16 %v172_v16, %v171_v15  ;;  %v507_v20 = vpack.c.bf16 %v174_v19, %v173_v18  ;;  %v175_v21 = vld [vmem:[#allocation7 + $0x50] sm:$0xff]  ;;  %v176_v22 = vld [vmem:[#allocation7 + $0x58] sm:$0xff]  ;;  %v177_v24 = vld [vmem:[#allocation7 + $0x60] sm:$0xff] }
  0x4f   :  { %v510_v23 = vpack.c.bf16 %v176_v22, %v175_v21  ;;  %v178_v25 = vld [vmem:[#allocation7 + $0x68] sm:$0xff]  ;;  %v179_v27 = vld [vmem:[#allocation7 + $0x70] sm:$0xff]  ;;  %v180_v28 = vld [vmem:[#allocation7 + $0x78] sm:$0xff] }
  0x50   :  { %419 = vmatmul.mubr.msk.f32.vlgmr.msra.gmra.mrb[0].mxu0 %vm90_vm1, %v80_v10  ;;  %v513_v26 = vpack.c.bf16 %v178_v25, %v177_v24  ;;  %v516_v29 = vpack.c.bf16 %v180_v28, %v179_v27  ;;  %v259_v30 = vld [vmem:[#allocation8] sm:$0xff]  ;;  %v260_v31 = vld [vmem:[#allocation8 + $0x8] sm:$0xff]  ;;  %v261_v32 = vld [vmem:[#allocation8 + $0x10] sm:$0xff] }
  0x51   :  { %488 = vmatprep.mubr.msk.f32.mxu0 %vm679_vm0, %v680_v1  ;;  %499 = vmatpush3.bf16.msra.mxu1 %v498_v11  ;;  %v519_v33 = vpack.c.bf16 %v260_v31, %v259_v30  ;;  %v262_v34 = vld [vmem:[#allocation8 + $0x18] sm:$0xff]  ;;  %v263_v36 = vld [vmem:[#allocation8 + $0x20] sm:$0xff]  ;;  %v264_v37 = vld [vmem:[#allocation8 + $0x28] sm:$0xff] }
  0x52   :  { %500 = vmatprep.subr.bf16.mxu1 %v678_v0  ;;  %v522_v35 = vpack.c.bf16 %v262_v34, %v261_v32  ;;  %v525_v38 = vpack.c.bf16 %v264_v37, %v263_v36  ;;  %v265_v39 = vld [vmem:[#allocation8 + $0x30] sm:$0xff]  ;;  %v266_v40 = vld [vmem:[#allocation8 + $0x38] sm:$0xff]  ;;  %v267_v42 = vld [vmem:[#allocation8 + $0x40] sm:$0xff] }
  0x53   :  { %520 = vmatpush3.bf16.msra.mxu0 %v519_v33  ;;  %v528_v41 = vpack.c.bf16 %v266_v40, %v265_v39  ;;  %v268_v43 = vld [vmem:[#allocation8 + $0x48] sm:$0xff]  ;;  %v269_v45 = vld [vmem:[#allocation8 + $0x50] sm:$0xff]  ;;  %v270_v46 = vld [vmem:[#allocation8 + $0x58] sm:$0xff] }
  0x54   :  { %521 = vmatprep.subr.bf16.mxu0 %v678_v0  ;;  %v531_v44 = vpack.c.bf16 %v268_v43, %v267_v42  ;;  %v534_v47 = vpack.c.bf16 %v270_v46, %v269_v45  ;;  %v271_v48 = vld [vmem:[#allocation8 + $0x60] sm:$0xff]  ;;  %v272_v49 = vld [vmem:[#allocation8 + $0x68] sm:$0xff]  ;;  %v273_v56 = vld [vmem:[#allocation8 + $0x70] sm:$0xff] }
  0x55   :  { %502 = vmatpush3.bf16.msra.mxu1 %v501_v14  ;;  %v537_v50 = vpack.c.bf16 %v272_v49, %v271_v48  ;;  %v373_v51 = vld [vmem:[%s822_s2] ss:$0 sm:$0xff]  ;;  %v274_v57 = vld [vmem:[#allocation8 + $0x78] sm:$0xff] }
  0x56   :  { %503 = vmatprep.subr.bf16.mxu1 %v678_v0  ;;  %v540_v58 = vpack.c.bf16 %v274_v57, %v273_v56  ;;  %v375_v59 = vld [vmem:[%s824_s4] ss:$0 sm:$0xff]  ;;  %s642_s4 = scalar_lea.vmem %s363_s29, 128 }
  0x57   :  { %523 = vmatpush3.bf16.msra.mxu0 %v522_v35  ;;  %p643_p4 = scmp.ne.s32.totalorder %s363_s29, %s642_s4  ;;  %p648_p6 = scmp.lt.s32.totalorder %s642_s4, %s642_s4 }
  0x58   :  { %524 = vmatprep.subr.bf16.mxu0 %v678_v0 }
  0x59   :  { %505 = vmatpush3.bf16.msra.mxu1 %v504_v17  ;;  %p649_p7 = por %p648_p6, %p647_p5 }
  0x5a   :  { %506 = vmatprep.subr.bf16.mxu1 %v678_v0 }
  0x5b   :  { %526 = vmatpush3.bf16.msra.mxu0 %v525_v38  ;;  %p650_p8 = pnand %p649_p7, %p643_p4 }
  0x5c   :  { %527 = vmatprep.subr.bf16.mxu0 %v678_v0 }
  0x5d   :  { %508 = vmatpush3.bf16.msra.mxu1 %v507_v20 }
  0x5e   :  { %509 = vmatprep.subr.bf16.mxu1 %v678_v0 }
  0x5f   :  { %529 = vmatpush3.bf16.msra.mxu0 %v528_v41 }
  0x60   :  { %530 = vmatprep.subr.bf16.mxu0 %v678_v0 }
  0x61   :  { %511 = vmatpush3.bf16.msra.mxu1 %v510_v23 }
  0x62   :  { %512 = vmatprep.subr.bf16.mxu1 %v678_v0 }
  0x63   :  { %532 = vmatpush3.bf16.msra.mxu0 %v531_v44 }
  0x64   :  { %533 = vmatprep.subr.bf16.mxu0 %v678_v0 }
  0x65   :  { %514 = vmatpush3.bf16.msra.mxu1 %v513_v26 }
  0x66   :  { %515 = vmatprep.subr.bf16.mxu1 %v678_v0 }
  0x67   :  { %535 = vmatpush3.bf16.msra.mxu0 %v534_v47 }
  0x68   :  { %536 = vmatprep.subr.bf16.mxu0 %v678_v0 }
  0x69   :  { %517 = vmatpush3.bf16.msra.mxu1 %v516_v29 }
  0x6b   :  { %538 = vmatpush3.bf16.msra.mxu0 %v537_v50 }
  0x6c   :  { %539 = vmatprep.subr.bf16.mxu0 %v678_v0  ;;  %v376_v0 = vld [vmem:[%s826_s6] ss:$0 sm:$0xff] }
  0x6f   :  { %541 = vmatpush3.bf16.msra.mxu0 %v540_v58 }
 0x123   :  { %v160_v52 = vpop.f32.mrb[0].mxu0 }
 0x124   :  { %v161_v53 = vadd.f32 %v373_v51, %v160_v52  ;;  %v420_v54 = vpop.f32.mrb[1].mxu0 }
 0x126   :  { %v164_v55 = vmax.f32 %v161_v53, 0.0 }
 0x128   :  { %454 = vmatmul.mubr.f32.vlgmr.msra.gmra.mrb[0].mxu1 %v164_v55 }
 0x1fb   :  { %v254_v60 = vpop.f32.mrb[0].mxu1 }
 0x1fc   :  { %v255_v61 = vadd.f32 %v375_v59, %v254_v60  ;;  %v455_v62 = vpop.f32.mrb[1].mxu1 }
 0x1fe   :  { %v258_v63 = vmax.f32 %v255_v61, 0.0 }
 0x200   :  { %489 = vmatmul.mubr.f32.vlgmr.msra.gmra.mrb[2].mxu0 %v258_v63 }
 0x2d3   :  { %v348_v1 = vpop.f32.mrb[2].mxu0 }
 0x2d4   :  { %v349_v2 = vadd.f32 %v376_v0, %v348_v1  ;;  %v490_v3 = vpop.f32.mrb[3].mxu0 }
 0x2d6   :  { %552 = vtanh.f32 %v349_v2 }
 0x2e0   :  { %v553_v4 = vpop.eup %552 }
 0x2e1   :  { %v353_v5 = vmul.f32 2.0, %v553_v4 }
 0x2e3   :  { %355 = vst [vmem:[#allocation10] sm:$0xff] %v353_v5 }
 0x2e4   :  { %653 = shalt.err (!%p650_p8)
}
 0x2e5   :  { %s654_s6 = scalar_lea.hbm %s827_s7, 128 }
 0x2e6   :  { %p655_p9 = scmp.ne.s32.totalorder %s827_s7, %s654_s6  ;;  %p658_p10 = scmp.lt.u32.totalorder %s654_s6, %s827_s7 }
 0x2e8   :  { %p660_p11 = pnand %p658_p10, %p655_p9 }
 0x2ea   :  { %663 = shalt.err (!%p660_p11)
}
 0x2eb   :  { %365 = dma.vmem_to_hbm [thread:$0]  %s363_s29, 128, %s827_s7, [#allocation4]  }
 0x2ec   :  { %670 = dma.done.wait [#allocation4], 128  }
 0x2ed   :  { %671 = vsyncadd [#allocation4], 4294967168 }
 0x2ee   :  { %369 = vsyncpa [#allocation3], 1 }
 0x2ef   :  { %370 = vsyncpa [#allocation6], 1 }
 0x2f0   :  { %371 = vsyncpa [#allocation9], 1 }
 0x2f1   :  { %372 = vsyncpa [#allocation4], 1 }

</bundles_post_ra>
